<compile_context>
chip_gen: v5e
topology: v5e:2x2
jax: 0.10.0
libtpu: 0.0.40
codegen_flags: <defaults>
</compile_context>

<pallas_src>
import functools

import numpy as np
import jax
import jax.numpy as jnp
from jax.experimental import pallas as pl
from jax.experimental.pallas import tpu as pltpu


# ----------------------------- Pallas kernel -------------------------------- #
def sab_kernel(g_ref, x_ref, w_ref, m_ref, b1_ref, w2_ref, b2_ref, out_ref,
               *, width, hw):
    # g_ref:  (Bt, Ci, HW)        x_ref: (Bt, Co, HW)
    # w_ref:  (Cm, 9*(Ci+Co))     m_ref: (9, HW) f32 validity masks per tap
    # b1_ref: (Cm, 1) VMEM        w2_ref: SMEM (Cm,)      b2_ref: SMEM (1,)
    # out_ref:(Bt, Co, HW)
    bt = g_ref.shape[0]
    cm = w_ref.shape[0]

    # ---- loop-invariant loads, hoisted out of the per-image loop ----
    w_big = w_ref[...].astype(jnp.float32)                   # (Cm, 9*C)
    b1 = b1_ref[...]                                          # (Cm, 1)
    b2 = b2_ref[0]                                            # scalar (SMEM)
    w2 = [w2_ref[c] for c in range(cm)]                       # scalars (SMEM)
    # tap 4 is the center tap (dy=dx=0): always valid, skip its mask multiply.
    masks = [None if k == 4 else m_ref[k:k + 1, :] for k in range(9)]

    for b in range(bt):
        g_b = g_ref[b].astype(jnp.float32)                    # (Ci, HW)
        x_b = x_ref[b].astype(jnp.float32)                    # (Co, HW)
        c_all = jnp.concatenate([g_b, x_b], axis=0)           # (Ci+Co, HW)

        # 3x3 "same" conv as ONE matmul: stack the 9 shifted+masked slices
        # along sublanes and contract against the merged weight.
        pieces = []
        for k in range(9):
            dy, dx = k // 3 - 1, k % 3 - 1
            d = dy * width + dx
            s = c_all if d == 0 else pltpu.roll(c_all, shift=(-d) % hw, axis=1)
            if masks[k] is not None:
                # mask the shifted INPUT so out-of-image taps contribute zero
                s = s * masks[k]
            pieces.append(s)
        stacked = jnp.concatenate(pieces, axis=0)             # (9*(Ci+Co), HW)

        h = jnp.dot(w_big, stacked, preferred_element_type=jnp.float32)  # (Cm, HW)
        h = jnp.maximum(h + b1, 0.0)

        # 1x1 conv -> scalar-broadcast multiply-adds on the VPU (no MXU push).
        att = w2[0] * h[0:1, :]
        for c in range(1, cm):
            att = att + w2[c] * h[c:c + 1, :]
        att = jnp.maximum(att + b2, 0.0)                      # (1, HW)

        # fuse == 'mul': broadcast attention over channels.
        out_ref[b] = (att * x_b).astype(out_ref.dtype)


# ------------------------------- glue (JAX) --------------------------------- #
def sab_pallas(g, x, w1, b1, w2, b2, *, batch_tile=1):
    """g: (N, inp, H, W), x: (N, oup, H, W) -> (N, oup, H, W)   (NCHW in/out)."""
    N, Ci, H, W = g.shape
    Co = x.shape[1]
    Cm = w1.shape[0]                  # inp // 2
    Ct = Ci + Co
    HW = H * W
    assert N % batch_tile == 0
    assert HW % 128 == 0              # lane-dense spatial layout

    # NCHW is already channel-major: flattening spatial is a zero-copy reshape.
    g_flat = g.reshape(N, Ci, HW)
    x_flat = x.reshape(N, Co, HW)

    # Merge the torch conv weight (Cm, Ci+Co, 3, 3) into one (Cm, 9*(Ci+Co))
    # block whose column-block k holds tap (ky,kx)=(k//3,k%3) with channel
    # order [g..., x...] (== torch.cat order) -> matches the stacked input.
    w_taps = jnp.transpose(w1, (2, 3, 0, 1)).reshape(9, Cm, Ct)      # (9, Cm, Ct)
    w_big = jnp.transpose(w_taps, (1, 0, 2)).reshape(Cm, 9 * Ct)     # (Cm, 9*Ct)
    w_big = w_big.astype(jnp.float32)

    b1_col = b1.reshape(Cm, 1).astype(jnp.float32)
    w2_vec = w2.reshape(Cm).astype(jnp.float32)
    b2_vec = b2.reshape(1).astype(jnp.float32)

    # Boundary-validity masks per tap, computed at trace time with numpy
    # (H, W are static) and shipped as a tiny grid-invariant f32 input.
    p = np.arange(HW)
    yy, xx = p // W, p % W
    masks = np.ones((9, HW), np.float32)
    for k in range(9):
        dy, dx = k // 3 - 1, k % 3 - 1
        valid = np.ones(HW, dtype=bool)
        if dy == -1:
            valid &= yy >= 1
        if dy == 1:
            valid &= yy <= H - 2
        if dx == -1:
            valid &= xx >= 1
        if dx == 1:
            valid &= xx <= W - 2
        masks[k] = valid
    masks = jnp.asarray(masks)

    kernel = functools.partial(sab_kernel, width=W, hw=HW)

    out_flat = pl.pallas_call(
        kernel,
        out_shape=jax.ShapeDtypeStruct((N, Co, HW), x.dtype),
        grid=(N // batch_tile,),
        in_specs=[
            pl.BlockSpec((batch_tile, Ci, HW), lambda i: (i, 0, 0)),   # g
            pl.BlockSpec((batch_tile, Co, HW), lambda i: (i, 0, 0)),   # x
            pl.BlockSpec((Cm, 9 * Ct), lambda i: (0, 0)),              # merged 3x3 weight
            pl.BlockSpec((9, HW), lambda i: (0, 0)),                   # boundary masks
            pl.BlockSpec((Cm, 1), lambda i: (0, 0)),                   # b1
            pl.BlockSpec(memory_space=pltpu.MemorySpace.SMEM),         # w2 scalars
            pl.BlockSpec(memory_space=pltpu.MemorySpace.SMEM),         # b2 scalar
        ],
        out_specs=pl.BlockSpec((batch_tile, Co, HW), lambda i: (i, 0, 0)),
        compiler_params=pltpu.CompilerParams(
            dimension_semantics=("parallel",)),
    )(g_flat, x_flat, w_big, masks, b1_col, w2_vec, b2_vec)

    return out_flat.reshape(N, Co, H, W)


# -------------------------- pure-JAX reference ------------------------------ #
def sab_reference(g, x, w1, b1, w2, b2):
    gc = jnp.concatenate([g, x], axis=1)
    h = jax.lax.conv_general_dilated(
        gc, w1, (1, 1), 'SAME', dimension_numbers=('NCHW', 'OIHW', 'NCHW'),
        precision=jax.lax.Precision.HIGHEST)
    h = jax.nn.relu(h + b1[None, :, None, None])
    att = jax.lax.conv_general_dilated(
        h, w2, (1, 1), 'SAME', dimension_numbers=('NCHW', 'OIHW', 'NCHW'),
        precision=jax.lax.Precision.HIGHEST)
    att = jax.nn.relu(att + b2[None, :, None, None])
    return att * x


# --------------------------------- main ------------------------------------- #
if __name__ == "__main__":
    # Small shapes: SAB(inp=4, oup=4, mode='spatial', fuse='mul')
    N, inp, oup, H, W = 2, 4, 4, 16, 16
    Ct, Cm = inp + oup, inp // 2

    key = jax.random.PRNGKey(0)
    kg, kx, kw1, kb1, kw2, kb2 = jax.random.split(key, 6)

    g = jax.random.normal(kg, (N, inp, H, W), jnp.float32)
    x = jax.random.normal(kx, (N, oup, H, W), jnp.float32)

    # Deterministic parameter init (shapes match nn.Conv2d in the module).
    w1 = 0.1 * jax.random.normal(kw1, (Cm, Ct, 3, 3), jnp.float32)
    b1 = 0.1 * jax.random.normal(kb1, (Cm,), jnp.float32)
    w2 = 0.1 * jax.random.normal(kw2, (1, Cm, 1, 1), jnp.float32)
    b2 = 0.1 * jax.random.normal(kb2, (1,), jnp.float32)

    out = jax.block_until_ready(sab_pallas(g, x, w1, b1, w2, b2, batch_tile=1))
    ref = jax.block_until_ready(sab_reference(g, x, w1, b1, w2, b2))

    assert out.shape == (N, oup, H, W)
    np.testing.assert_allclose(np.asarray(out), np.asarray(ref),
                               rtol=1e-4, atol=1e-4)
    print("KERNEL_OK")
</pallas_src>

<mosaic_0001>
module attributes {stable_mosaic.version = 11 : i64} {
  func.func @sab_kernel(%arg0: i32, %arg1: memref<1x4x256xf32, #tpu.memory_space<vmem>>, %arg2: memref<1x4x256xf32, #tpu.memory_space<vmem>>, %arg3: memref<2x72xf32, #tpu.memory_space<vmem>>, %arg4: memref<9x256xf32, #tpu.memory_space<vmem>>, %arg5: memref<2x1xf32, #tpu.memory_space<vmem>>, %arg6: memref<2xf32, #tpu.memory_space<smem>>, %arg7: memref<1xf32, #tpu.memory_space<smem>>, %arg8: memref<1x4x256xf32, #tpu.memory_space<vmem>>) attributes {dimension_semantics = [#tpu.dimension_semantics<parallel>], iteration_bounds = array<i64: 2>, scalar_prefetch = 0 : i64, scratch_operands = 0 : i64, tpu.core_type = #tpu.core_type<tc>, window_params = [{transform_indices = @transform_0, window_bounds = array<i64: 1, 4, 256>}, {transform_indices = @transform_1, window_bounds = array<i64: 1, 4, 256>}, {pipeline_mode = #tpu.pipeline_mode<synchronous>, transform_indices = @transform_2, window_bounds = array<i64: 2, 72>}, {pipeline_mode = #tpu.pipeline_mode<synchronous>, transform_indices = @transform_3, window_bounds = array<i64: 9, 256>}, {pipeline_mode = #tpu.pipeline_mode<synchronous>, transform_indices = @transform_4, window_bounds = array<i64: 2, 1>}, {transform_indices = @transform_5, window_bounds = array<i64: 2>}, {transform_indices = @transform_6, window_bounds = array<i64: 1>}, {transform_indices = @transform_7, window_bounds = array<i64: 1, 4, 256>}]} {
    %c0 = arith.constant 0 : index
    %c0_0 = arith.constant 0 : index
    %0 = vector.load %arg3[%c0, %c0_0] : memref<2x72xf32, #tpu.memory_space<vmem>>, vector<2x72xf32>
    %c0_1 = arith.constant 0 : index
    %c0_2 = arith.constant 0 : index
    %1 = vector.load %arg5[%c0_1, %c0_2] : memref<2x1xf32, #tpu.memory_space<vmem>>, vector<2x1xf32>
    %c0_3 = arith.constant 0 : index
    %2 = memref.load %arg7[%c0_3] : memref<1xf32, #tpu.memory_space<smem>>
    %c0_4 = arith.constant 0 : index
    %3 = memref.load %arg6[%c0_4] : memref<2xf32, #tpu.memory_space<smem>>
    %c1 = arith.constant 1 : index
    %4 = memref.load %arg6[%c1] : memref<2xf32, #tpu.memory_space<smem>>
    %c0_5 = arith.constant 0 : index
    %c0_6 = arith.constant 0 : index
    %5 = vector.load %arg4[%c0_5, %c0_6] : memref<9x256xf32, #tpu.memory_space<vmem>>, vector<1x256xf32>
    %c1_7 = arith.constant 1 : index
    %c0_8 = arith.constant 0 : index
    %6 = vector.load %arg4[%c1_7, %c0_8] : memref<9x256xf32, #tpu.memory_space<vmem>>, vector<1x256xf32>
    %c2 = arith.constant 2 : index
    %c0_9 = arith.constant 0 : index
    %7 = vector.load %arg4[%c2, %c0_9] : memref<9x256xf32, #tpu.memory_space<vmem>>, vector<1x256xf32>
    %c3 = arith.constant 3 : index
    %c0_10 = arith.constant 0 : index
    %8 = vector.load %arg4[%c3, %c0_10] : memref<9x256xf32, #tpu.memory_space<vmem>>, vector<1x256xf32>
    %c5 = arith.constant 5 : index
    %c0_11 = arith.constant 0 : index
    %9 = vector.load %arg4[%c5, %c0_11] : memref<9x256xf32, #tpu.memory_space<vmem>>, vector<1x256xf32>
    %c6 = arith.constant 6 : index
    %c0_12 = arith.constant 0 : index
    %10 = vector.load %arg4[%c6, %c0_12] : memref<9x256xf32, #tpu.memory_space<vmem>>, vector<1x256xf32>
    %c7 = arith.constant 7 : index
    %c0_13 = arith.constant 0 : index
    %11 = vector.load %arg4[%c7, %c0_13] : memref<9x256xf32, #tpu.memory_space<vmem>>, vector<1x256xf32>
    %c8 = arith.constant 8 : index
    %c0_14 = arith.constant 0 : index
    %12 = vector.load %arg4[%c8, %c0_14] : memref<9x256xf32, #tpu.memory_space<vmem>>, vector<1x256xf32>
    %c0_15 = arith.constant 0 : index
    %c0_16 = arith.constant 0 : index
    %c0_17 = arith.constant 0 : index
    %13 = vector.load %arg1[%c0_15, %c0_16, %c0_17] : memref<1x4x256xf32, #tpu.memory_space<vmem>>, vector<1x4x256xf32>
    %14 = vector.shape_cast %13 : vector<1x4x256xf32> to vector<4x256xf32>
    %c0_18 = arith.constant 0 : index
    %c0_19 = arith.constant 0 : index
    %c0_20 = arith.constant 0 : index
    %15 = vector.load %arg2[%c0_18, %c0_19, %c0_20] : memref<1x4x256xf32, #tpu.memory_space<vmem>>, vector<1x4x256xf32>
    %16 = vector.shape_cast %15 : vector<1x4x256xf32> to vector<4x256xf32>
    %17 = tpu.concatenate %14, %16 in 0 : vector<4x256xf32>, vector<4x256xf32> -> vector<8x256xf32>
    %c17_i32 = arith.constant 17 : i32
    %18 = tpu.dynamic_rotate %17 by %c17_i32 dim 1 : vector<8x256xf32>, i32 -> vector<8x256xf32>
    %19 = vector.broadcast %5 : vector<1x256xf32> to vector<8x256xf32>
    %20 = arith.mulf %18, %19 : vector<8x256xf32>
    %c16_i32 = arith.constant 16 : i32
    %21 = tpu.dynamic_rotate %17 by %c16_i32 dim 1 : vector<8x256xf32>, i32 -> vector<8x256xf32>
    %22 = vector.broadcast %6 : vector<1x256xf32> to vector<8x256xf32>
    %23 = arith.mulf %21, %22 : vector<8x256xf32>
    %c15_i32 = arith.constant 15 : i32
    %24 = tpu.dynamic_rotate %17 by %c15_i32 dim 1 : vector<8x256xf32>, i32 -> vector<8x256xf32>
    %25 = vector.broadcast %7 : vector<1x256xf32> to vector<8x256xf32>
    %26 = arith.mulf %24, %25 : vector<8x256xf32>
    %c1_i32 = arith.constant 1 : i32
    %27 = tpu.dynamic_rotate %17 by %c1_i32 dim 1 : vector<8x256xf32>, i32 -> vector<8x256xf32>
    %28 = vector.broadcast %8 : vector<1x256xf32> to vector<8x256xf32>
    %29 = arith.mulf %27, %28 : vector<8x256xf32>
    %c255_i32 = arith.constant 255 : i32
    %30 = tpu.dynamic_rotate %17 by %c255_i32 dim 1 : vector<8x256xf32>, i32 -> vector<8x256xf32>
    %31 = vector.broadcast %9 : vector<1x256xf32> to vector<8x256xf32>
    %32 = arith.mulf %30, %31 : vector<8x256xf32>
    %c241_i32 = arith.constant 241 : i32
    %33 = tpu.dynamic_rotate %17 by %c241_i32 dim 1 : vector<8x256xf32>, i32 -> vector<8x256xf32>
    %34 = vector.broadcast %10 : vector<1x256xf32> to vector<8x256xf32>
    %35 = arith.mulf %33, %34 : vector<8x256xf32>
    %c240_i32 = arith.constant 240 : i32
    %36 = tpu.dynamic_rotate %17 by %c240_i32 dim 1 : vector<8x256xf32>, i32 -> vector<8x256xf32>
    %37 = vector.broadcast %11 : vector<1x256xf32> to vector<8x256xf32>
    %38 = arith.mulf %36, %37 : vector<8x256xf32>
    %c239_i32 = arith.constant 239 : i32
    %39 = tpu.dynamic_rotate %17 by %c239_i32 dim 1 : vector<8x256xf32>, i32 -> vector<8x256xf32>
    %40 = vector.broadcast %12 : vector<1x256xf32> to vector<8x256xf32>
    %41 = arith.mulf %39, %40 : vector<8x256xf32>
    %42 = tpu.concatenate %20, %23, %26, %29, %17, %32, %35, %38, %41 in 0 : vector<8x256xf32>, vector<8x256xf32>, vector<8x256xf32>, vector<8x256xf32>, vector<8x256xf32>, vector<8x256xf32>, vector<8x256xf32>, vector<8x256xf32>, vector<8x256xf32> -> vector<72x256xf32>
    %cst = arith.constant dense<0.000000e+00> : vector<2x256xf32>
    %43 = tpu.matmul %0, %42, %cst {dimension_numbers = #tpu.dot_dimension_numbers<[1], [0], [0], [1], [0, 0, 1, 1], [], []>} : vector<2x72xf32>, vector<72x256xf32>, vector<2x256xf32> -> vector<2x256xf32>
    %44 = vector.broadcast %1 : vector<2x1xf32> to vector<2x256xf32>
    %45 = arith.addf %43, %44 : vector<2x256xf32>
    %cst_21 = arith.constant 0.000000e+00 : f32
    %46 = vector.broadcast %cst_21 : f32 to vector<2x256xf32>
    %47 = arith.maximumf %45, %46 : vector<2x256xf32>
    %48 = vector.extract_strided_slice %47 {offsets = [0, 0], sizes = [1, 256], strides = [1, 1]} : vector<2x256xf32> to vector<1x256xf32>
    %49 = vector.broadcast %3 : f32 to vector<1x256xf32>
    %50 = arith.mulf %49, %48 : vector<1x256xf32>
    %51 = vector.extract_strided_slice %47 {offsets = [1, 0], sizes = [1, 256], strides = [1, 1]} : vector<2x256xf32> to vector<1x256xf32>
    %52 = vector.broadcast %4 : f32 to vector<1x256xf32>
    %53 = arith.mulf %52, %51 : vector<1x256xf32>
    %54 = arith.addf %50, %53 : vector<1x256xf32>
    %55 = vector.broadcast %2 : f32 to vector<1x256xf32>
    %56 = arith.addf %54, %55 : vector<1x256xf32>
    %cst_22 = arith.constant 0.000000e+00 : f32
    %57 = vector.broadcast %cst_22 : f32 to vector<1x256xf32>
    %58 = arith.maximumf %56, %57 : vector<1x256xf32>
    %59 = vector.broadcast %58 : vector<1x256xf32> to vector<4x256xf32>
    %60 = arith.mulf %59, %16 : vector<4x256xf32>
    %c0_23 = arith.constant 0 : index
    %c0_24 = arith.constant 0 : index
    %c0_25 = arith.constant 0 : index
    %61 = vector.load %arg8[%c0_23, %c0_24, %c0_25] : memref<1x4x256xf32, #tpu.memory_space<vmem>>, vector<1x4x256xf32>
    %62 = vector.shape_cast %61 : vector<1x4x256xf32> to vector<4x256xf32>
    %63 = vector.shape_cast %60 : vector<4x256xf32> to vector<1x4x256xf32>
    tpu.vector_store %arg8[%c0_23, %c0_24, %c0_25], %63 {strides = array<i32>} : memref<1x4x256xf32, #tpu.memory_space<vmem>>, vector<1x4x256xf32>,
    return
  }
  func.func @transform_0(%arg0: i32) -> (i32, i32, i32) {
    %c0_i32 = arith.constant 0 : i32
    %c0_i32_0 = arith.constant 0 : i32
    %c0_i32_1 = arith.constant 0 : i32
    return %arg0, %c0_i32, %c0_i32_0 : i32, i32, i32
  }
  func.func @transform_1(%arg0: i32) -> (i32, i32, i32) {
    %c0_i32 = arith.constant 0 : i32
    %c0_i32_0 = arith.constant 0 : i32
    %c0_i32_1 = arith.constant 0 : i32
    return %arg0, %c0_i32, %c0_i32_0 : i32, i32, i32
  }
  func.func @transform_2(%arg0: i32) -> (i32, i32) {
    %c0_i32 = arith.constant 0 : i32
    %c0_i32_0 = arith.constant 0 : i32
    %c0_i32_1 = arith.constant 0 : i32
    return %c0_i32, %c0_i32_0 : i32, i32
  }
  func.func @transform_3(%arg0: i32) -> (i32, i32) {
    %c0_i32 = arith.constant 0 : i32
    %c0_i32_0 = arith.constant 0 : i32
    %c0_i32_1 = arith.constant 0 : i32
    return %c0_i32, %c0_i32_0 : i32, i32
  }
  func.func @transform_4(%arg0: i32) -> (i32, i32) {
    %c0_i32 = arith.constant 0 : i32
    %c0_i32_0 = arith.constant 0 : i32
    %c0_i32_1 = arith.constant 0 : i32
    return %c0_i32, %c0_i32_0 : i32, i32
  }
  func.func @transform_5(%arg0: i32) -> i32 {
    %c0_i32 = arith.constant 0 : i32
    %c0_i32_0 = arith.constant 0 : i32
    return %c0_i32 : i32
  }
  func.func @transform_6(%arg0: i32) -> i32 {
    %c0_i32 = arith.constant 0 : i32
    %c0_i32_0 = arith.constant 0 : i32
    return %c0_i32 : i32
  }
  func.func @transform_7(%arg0: i32) -> (i32, i32, i32) {
    %c0_i32 = arith.constant 0 : i32
    %c0_i32_0 = arith.constant 0 : i32
    %c0_i32_1 = arith.constant 0 : i32
    return %arg0, %c0_i32, %c0_i32_0 : i32, i32, i32
  }
}

</mosaic_0001>

<bundles_post_ra>
// kernel: tpu_custom_call.1
= control target key start
LH: loop header
LB: loop body
LE: loop exit
PB: predicated region body
PF: predicated region fallthrough
CT: control target
= control target key end

     0   :  { %s1316_s0 = inlined_call_operand.hbm [shape: f32[2,4,256], index: 0, kind: input, shape index: {}]   ;;  %s1317_s1 = inlined_call_operand.hbm [shape: f32[2,4,256], index: 1, kind: input, shape index: {}]   ;;  %s1318_s2 = inlined_call_operand.vmem [shape: f32[2,72], index: 2, kind: input, shape index: {}]   ;;  %s1319_s3 = inlined_call_operand.hbm [shape: f32[9,256], index: 3, kind: input, shape index: {}]   ;;  %s1320_s4 = inlined_call_operand.vmem [shape: f32[2,1], index: 4, kind: input, shape index: {}]   ;;  %s1321_s5 = inlined_call_operand.vmem [shape: f32[2], index: 5, kind: input, shape index: {}]   ;;  %s1322_s6 = inlined_call_operand.<no memory space> [shape: f32[1], index: 6, kind: input, shape index: {}]   ;;  %s1323_s7 = inlined_call_operand.hbm [shape: f32[2,4,256], index: 7, kind: output, shape index: {}]  }
   0x1   :  { %1327 = sst [smem:[#allocation20_spill]] %s1319_s3 }
   0x2   :  { %1328 = sst [smem:[#allocation21_spill]] %s1321_s5 }
   0x3   :  { %12 = sst [smem:[#allocation2]] %s1322_s6 }
   0x4   :  { %13 = vsyncpa [#allocation4], 0 }
   0x5   :  { %15 = vsyncpa [#allocation4 + $0x1], 0 }
   0x6   :  { %16 = vsyncpa [#allocation8], 0 }
   0x7   :  { %18 = vsyncpa [#allocation8 + $0x1], 0 }
   0x8   :  { %19 = vsyncpa [#allocation6], 0 }
   0x9   :  { %20 = vsyncpa [#allocation5], 0 }
   0xa   :  { %22 = vsyncpa [#allocation5 + $0x1], 0  ;;  %s1090_s26 = smov 0   ;;  %s1092_s27 = smov 0  }
   0xb   :  { %s1094_s28 = smov 0   ;;  %s1096_s29 = smov 0  }
   0xc LB: > { %1329 = sst [smem:[#allocation17_spill]] %s1028_s28  ;;  %s1114_s9 = sadd.s32 4294967295, %s1032_s29   ;;  %s1032_s29 = sphi %s1096_s29, %s1341_s29   ;;  %s1028_s28 = sphi %s1094_s28, %s1343_s28   ;;  %s1024_s27 = sphi %s1092_s27, %s1345_s27   ;;  %s1020_s26 = sphi %s1090_s26, %s1344_s26  }
   0xd   : > { %s1330_s3 = sld [smem:[#allocation20_spill]]  ;;  %p737_p0 = scmp.ge.s32.totalorder %s1032_s29, 1 }
   0xe   : > { %p49_p1 = scmp.eq.s32.totalorder %s1114_s9, 0  ;;  %p216_p2 = scmp.lt.s32.totalorder %s1032_s29, 3 }
   0xf   : > { %s1034_s11 = smov [#allocation9]   ;;  %s1332_s5 = sld [smem:[#allocation21_spill]] }
  0x10   : > { %p1119_p3 = pnand %p737_p0, %p216_p2  ;;  %s232_s12 = sshll.u32 %s1034_s11, 4  ;;  %s233_s12 = int_to_ptr.vmem [resolvable:$true] %s232_s12 }
  0x11   : > { %s1035_s16 = smov 256   ;;  %s1036_s17 = smov 16  }
  0x12   : > { %p778_p4 = pneg %p1119_p3  ;;  %s1037_s18 = smov [#allocation10]  }
  0x13   : > { %s230_s8 = sshll.u32 %s1330_s3, 4  ;;  %s736_s19 = sadd.s32 4294967294, %s1032_s29   ;;  %s231_s8 = int_to_ptr.hbm [resolvable:$true] %s230_s8 }
  0x14   : > { %p779_p6 = pnand %p778_p4, %p49_p1  ;;  %s1133_s20 = sadd.s32 1, %s1032_s29  }
  0x15   : > { %s248_s15 = sshll.u32 %s1332_s5, 4  ;;  %1333 = sst [smem:[#allocation18_spill]] %s1133_s20  ;;  %s249_s15 = int_to_ptr.vmem [resolvable:$true] %s248_s15 }
  0x16   : > { %781 = dma.hbm_to_vmem [thread:$0]  (!%p779_p6), %s231_s8, 512, %s233_s12, [#allocation8], %s1035_s16, %s1035_s16, %s1036_s17  }
  0x17   : > { %784 = dma.vmem_to_smem (!%p779_p6), %s249_s15, 16, %s1037_s18, [#allocation6]  }
  0x18   : > { %s32_s21 = ssub.s32 %s1032_s29, %s1133_s20  ;;  %s35_s22 = sadd.s32 1, %s1028_s28 }
  0x19   : > { %p33_p7 = scmp.eq.s32.totalorder %s32_s21, 0  ;;  %p42_p8 = scmp.ne.s32.totalorder %s1028_s28, %s1024_s27 }
  0x1a   : > { %p43_p9 = scmp.eq.s32.totalorder %s1032_s29, 0  ;;  %p48_p10 = scmp.ne.s32.totalorder %s1024_s27, %s1020_s26 }
  0x1b   : > { %s1144_s23 = scalar_select %p33_p7, %s1028_s28, %s35_s22  }
  0x1c   : > { %p1146_p11 = por %p43_p9, %p42_p8  ;;  %p1152_p12 = por %p49_p1, %p48_p10 }
  0x1d   : > { %1334 = sst [smem:[#allocation19_spill]] %s1144_s23  ;;  %p203_p13 = scmp.eq.s32.totalorder %s1114_s9, 1 }
  0x1e   : > { %p209_p0 = scmp.eq.s32.totalorder %s736_s19, 1  ;;  %p798_p2 = scmp.lt.s32.totalorder %s1032_s29, 2 }
  0x1f   : > { %s262_s6 = sand.u32 1, %s1028_s28   ;;  %p1159_p4 = por %p203_p13, %p42_p8 }
  0x20   : > { %p1163_p6 = por %p209_p0, %p48_p10  ;;  %s1167_s11 = sshll.u32 %s262_s6, 3 }
  0x21   : > { %s761_s12 = sshll.u32 %s1032_s29, 3  ;;  %s266_s16 = scalar_lea.vmem [#allocation3], %s1167_s11 }
  0x22   : > { %s271_s15 = scalar_lea.hbm %s1316_s0, %s761_s12  ;;  %s275_s17 = sshll.u32 %s266_s16, 4  ;;  %s276_s17 = int_to_ptr.vmem [resolvable:$true] %s275_s17 }
  0x23   : > { %s273_s18 = sshll.u32 %s271_s15, 4  ;;  %p1176_p7 = pnand %p798_p2, %p1146_p11  ;;  %s274_s18 = int_to_ptr.hbm [resolvable:$true] %s273_s18 }
  0x24   : > { %s291_s3 = scalar_lea.hbm %s1317_s1, %s761_s12  ;;  %s282_s5 = sand.u32 1, %s1032_s29  }
  0x25   : > { %s263_s23 = scalar_lea.sflag [#allocation4], %s262_s6  ;;  %s894_s13 = sshra.s32 %s274_s18, 4  ;;  %s895_s13 = int_to_ptr.hbm [resolvable:$true] %s894_s13 }
  0x26   : > { %s896_s14 = scalar_lea.hbm %s895_s13, 8  ;;  %p898_p9 = pneg %p1176_p7 }
  0x27   : > { %p897_p8 = scmp.ne.s32.totalorder %s895_s13, %s896_s14  ;;  %s901_s16 = scalar_lea.hbm %s1316_s0, 16 }
  0x28   : > { %p902_p13 = scmp.lt.s32.totalorder %s895_s13, %s1316_s0  ;;  %p903_p0 = scmp.lt.s32.totalorder %s901_s16, %s896_s14 }
  0x29   : > { %p899_p10 = pnand %p898_p9, %p897_p8 }
  0x2a   : > { %p904_p2 = por %p903_p0, %p902_p13 }
  0x2b   : > { %p900_p11 = pneg %p899_p10 }
  0x2d   : > { %p905_p5 = pnand %p904_p2, %p900_p11 }
  0x2f   : > { %908 = shalt.err (!%p905_p5)
}
  0x30   : > { %788 = dma.hbm_to_vmem [thread:$0]  (!%p1176_p7), %s274_s18, 128, %s276_s17, %s263_s23  }
  0x31   : > { %s293_s6 = sshll.u32 %s291_s3, 4  ;;  %s286_s12 = scalar_lea.vmem [#allocation7], %s1167_s11  ;;  %s294_s6 = int_to_ptr.hbm [resolvable:$true] %s293_s6 }
  0x32   : > { %s295_s28 = sshll.u32 %s286_s12, 4  ;;  %s283_s24 = scalar_lea.sflag [#allocation8], %s282_s5  ;;  %s296_s28 = int_to_ptr.vmem [resolvable:$true] %s295_s28 }
  0x33   : > { %s924_s15 = sshra.s32 %s294_s6, 4  ;;  %s931_s16 = scalar_lea.hbm %s1317_s1, 16  ;;  %s925_s15 = int_to_ptr.hbm [resolvable:$true] %s924_s15 }
  0x34   : > { %s926_s20 = scalar_lea.hbm %s925_s15, 8  ;;  %p932_p5 = scmp.lt.s32.totalorder %s925_s15, %s1317_s1 }
  0x35   : > { %p927_p8 = scmp.ne.s32.totalorder %s925_s15, %s926_s20  ;;  %p933_p13 = scmp.lt.s32.totalorder %s931_s16, %s926_s20 }
  0x37   : > { %p929_p10 = pnand %p927_p8, %p898_p9  ;;  %p934_p0 = por %p933_p13, %p932_p5 }
  0x39   : > { %p930_p11 = pneg %p929_p10 }
  0x3b   : > { %p935_p2 = pnand %p934_p0, %p930_p11 }
  0x3d   : > { %938 = shalt.err (!%p935_p2)
}
  0x3e   : > { %791 = dma.hbm_to_vmem [thread:$0]  (!%p1176_p7), %s294_s6, 128, %s296_s28, %s283_s24  }
  0x3f   : > { %304 = sbr.rel (%p1119_p3) target bundleno = 405 (0x195), region = 48  ;;  %s1212_s3 = sand.u32 (!%p1119_p3), 1, %s1024_s27  }
  0x40   : > { %s1215_s5 = sshll.u32 (!%p1119_p3), %s1212_s3, 3  ;;  %s307_s11 = scalar_lea.sflag (!%p1119_p3), [#allocation4], %s1212_s3 }
  0x41   : > { %s310_s20 = scalar_lea.vmem (!%p1119_p3), [#allocation3], %s1215_s5 }
  0x44   : > { %999 = dma.done.wait (%p1152_p12), %s307_s11, 128  }
  0x45   : > { %1001 = vsyncadd (%p1152_p12), %s307_s11, 4294967168  ;;  %s316_s28 = sand.u32 1, %s1114_s9   ;;  %s320_s17 = scalar_lea.vmem [#allocation7], %s1215_s5 }
  0x46   : > { %s317_s10 = scalar_lea.sflag [#allocation8], %s316_s28 }
  0x47   : > { %1003 = dma.done.wait (%p1152_p12), %s317_s10, 128  }
  0x48   : > { %1005 = vsyncadd (%p1152_p12), %s317_s10, 4294967168 }
  0x49   : > { %1007 = dma.done.wait (%p49_p1), [#allocation8], 512  }
  0x4a   : > { %1009 = vsyncadd (%p49_p1), [#allocation8], 4294966784 }
  0x4b   : > { %1011 = dma.done.wait (%p49_p1), [#allocation6], 16  }
  0x4c   : > { %1013 = vsyncadd (%p49_p1), [#allocation6], 4294967280 }
  0x4d   : > { %336 = sfence }
  0x4e   : > { %v388_v0 = vld [vmem:[%s310_s20] sm:$0xff]  ;;  %v389_v1 = vld [vmem:[%s320_s17] sm:$0xff]  ;;  %vm403_vm0 = vcmask 1043456   ;;  %s1038_s25 = smov 112   ;;  %s1039_s18 = smov 111   ;;  %v410_v9 = vlaneseq  ;;  %v1046_v42 = vmov 0  }
  0x4f   : > { %391 = vst [vmem:[#allocation1] ss:$2 sm:$0xff] %v388_v0  ;;  %s1040_s19 = smov 113   ;;  %s1041_s22 = smov 127   ;;  %v369_v41 = vld [vmem:[%s1320_s4] sm:$0x3]  ;;  %847 = vset.pattern.permute.xlu1 %v1046_v42  ;;  %848 = vset.pattern.permute.xlu0 %v1046_v42 }
  0x50   : > { %s1042_s6 = smov 1   ;;  %s1043_s12 = smov 15   ;;  %v1259_v12 = vand.u32 127, %v410_v9  ;;  %v387_v13 = vld [vmem:[#allocation9 + $0x10] ss:$8 sm:$0x3] }
  0x51   : > { %s1044_s24 = smov 16   ;;  %s1045_s15 = smov 17   ;;  %v385_v15 = vld [vmem:[#allocation9 + $0x7] ss:$8 sm:$0x3]  ;;  %v514_v16 = vperm.slane %v387_v13, 0 }
  0x52   : > { %vm496_vm1 = vcmp.lt.s32.totalorder %v1259_v12, 112  ;;  %vm510_vm2 = vcmp.lt.s32.totalorder %v1259_v12, 111  ;;  %v515_v17 = vperm.slane %v387_v13, 1  ;;  %v383_v18 = vld [vmem:[#allocation9 + $0x6] ss:$8 sm:$0x3] }
  0x53   : > { %vm482_vm3 = vcmp.lt.s32.totalorder %v1259_v12, 113  ;;  %v500_v21 = vperm.slane %v385_v15, 0  ;;  %v501_v22 = vperm.slane %v385_v15, 1  ;;  %v486_v29 = vperm.slane %v383_v18, 0  ;;  %s753_s23 = sld [smem:[#allocation10 + $0x1]]  ;;  %s763_s28 = sshll.u32 %s1114_s9, 3 }
  0x54   : > { %v487_v30 = vperm.slane %v383_v18, 1  ;;  %v381_v33 = vld [vmem:[#allocation9 + $0x5] ss:$8 sm:$0x3]  ;;  %vm468_vm4 = vcmp.lt.s32.totalorder %v1259_v12, 127  ;;  %vm454_vm5 = vcmp.lt.s32.totalorder %v1259_v12, 1 }
  0x55   : > { %v472_v39 = vperm.slane %v381_v33, 0  ;;  %v473_v40 = vperm.slane %v381_v33, 1  ;;  %v379_v49 = vld [vmem:[#allocation9 + $0x3] ss:$8 sm:$0x3]  ;;  %vm440_vm6 = vcmp.lt.s32.totalorder %v1259_v12, 15 }
  0x56   : > { %v392_v2 = vld.sshfl [vmem:[#allocation1] sm:$0xff pattern:$0x75316420]  ;;  %v393_v3 = vld.sshfl [vmem:[#allocation1 + $0x8] sm:$0xff pattern:$0x75316420] }
  0x57   : > { %398 = vst [vmem:[#allocation1 + $0x1] ss:$2 sm:$0xff] %v389_v1  ;;  %v377_v50 = vld [vmem:[#allocation9 + $0x2] ss:$8 sm:$0x3]  ;;  %v458_v51 = vperm.slane %v379_v49, 0 }
  0x58   : > { %v459_v52 = vperm.slane %v379_v49, 1  ;;  %v444_v54 = vperm.slane %v377_v50, 0  ;;  %v445_v55 = vperm.slane %v377_v50, 1  ;;  %vm426_vm7 = vcmp.lt.s32.totalorder %v1259_v12, 16  ;;  %s371_s11 = sld [smem:[#allocation10]]  ;;  %s606_s9 = scalar_lea.sflag [#allocation5], %s1212_s3 }
  0x59   : > { %vm412_vm8 = vcmp.lt.s32.totalorder %v1259_v12, 17  ;;  %vm525_vm9 = vcmask 588800   ;;  %s370_s20 = sld [smem:[#allocation2]] }
  0x5e   : > { %v399_v4 = vld.sshfl [vmem:[#allocation1] sm:$0xff pattern:$0x75316420]  ;;  %v400_v5 = vld.sshfl [vmem:[#allocation1 + $0x8] sm:$0xff pattern:$0x75316420] }
  0x5f   : > { %v1238_v6 = vsel %vm403_vm0, %v392_v2, %v399_v4  ;;  %592 = vst [vmem:[#allocation1] ss:$2 sm:$0xff] %v389_v1  ;;  %v1244_v7 = vsel %vm403_vm0, %v393_v3, %v400_v5  ;;  %v375_v2 = vld [vmem:[#allocation9 + $0x1] ss:$8 sm:$0x3] }
  0x60   : > { %492 = vrot.lane.b32.xlu1 %v1238_v6, %s1038_s25  ;;  %506 = vrot.lane.b32.xlu0 %v1238_v6, %s1039_s18  ;;  %v430_v3 = vperm.slane %v375_v2, 0  ;;  %v431_v4 = vperm.slane %v375_v2, 1 }
  0x61   : > { %478 = vrot.lane.b32.xlu2 %v1238_v6, %s1040_s19 }
  0x68   : > { %494 = vrot.lane.b32.xlu1 %v1244_v7, %s1038_s25  ;;  %508 = vrot.lane.b32.xlu0 %v1244_v7, %s1039_s18  ;;  %s617_s25 = scalar_lea.hbm %s1323_s7, %s763_s28  ;;  %s367_s18 = scalar_lea.vmem [#allocation11], %s1215_s5 }
  0x69   : > { %480 = vrot.lane.b32.xlu2 %v1244_v7, %s1040_s19  ;;  %s619_s19 = sshll.u32 %s367_s18, 4  ;;  %s974_s5 = scalar_lea.hbm %s1323_s7, 16  ;;  %s620_s19 = int_to_ptr.vmem [resolvable:$true] %s619_s19 }
  0x70   : > { %466 = vrot.lane.b32.xlu1 %v1244_v7, %s1041_s22  ;;  %464 = vrot.lane.b32.xlu0 %v1238_v6, %s1041_s22  ;;  %s621_s22 = sshll.u32 %s617_s25, 4  ;;  %s622_s22 = int_to_ptr.hbm [resolvable:$true] %s621_s22 }
  0x71   : > { %450 = vrot.lane.b32.xlu2 %v1238_v6, %s1042_s6 }
  0x78   : > { %436 = vrot.lane.b32.xlu1 %v1238_v6, %s1043_s12  ;;  %452 = vrot.lane.b32.xlu0 %v1244_v7, %s1042_s6  ;;  %s968_s6 = sshra.s32 %s622_s22, 4  ;;  %s969_s6 = int_to_ptr.hbm [resolvable:$true] %s968_s6 }
  0x79   : > { %438 = vrot.lane.b32.xlu2 %v1244_v7, %s1043_s12  ;;  %s970_s12 = scalar_lea.hbm %s969_s6, 8  ;;  %p975_p7 = scmp.lt.s32.totalorder %s969_s6, %s1323_s7 }
  0x7a   : > { %p971_p1 = scmp.ne.s32.totalorder %s969_s6, %s970_s12  ;;  %p976_p9 = scmp.lt.s32.totalorder %s974_s5, %s970_s12 }
  0x7c   : > { %p972_p3 = pnand %p971_p1, %p1159_p4  ;;  %p977_p8 = por %p976_p9, %p975_p7 }
  0x7e   : > { %p973_p12 = pneg %p972_p3 }
  0x80   : > { %424 = vrot.lane.b32.xlu1 %v1244_v7, %s1044_s24  ;;  %422 = vrot.lane.b32.xlu0 %v1238_v6, %s1044_s24  ;;  %p978_p10 = pnand %p977_p8, %p973_p12 }
  0x81   : > { %406 = vrot.lane.b32.xlu2 %v1238_v6, %s1045_s15 }
  0x88   : > { %408 = vrot.lane.b32.xlu0 %v1244_v7, %s1045_s15  ;;  %522 = vperm.xlu1 %847, %v369_v41  }
  0xbb   : > { %v479_v8 = vpop.permute.xlu2 %478 }
  0xc3   : > { %v481_v14 = vpop.permute.xlu2 %480 }
  0xc4   : > { %v483_v31 = vsel %vm482_vm3, %v479_v8, %v481_v14  ;;  %v484_v32 = vsel %vm482_vm3, %v481_v14, %v479_v8 }
  0xc5   : > { %v490_v37 = vmul.f32 %v486_v29, %v483_v31  ;;  %v491_v38 = vmul.f32 %v487_v30, %v484_v32  ;;  %v571_v29 = vstv %s371_s11 }
  0xcb   : > { %v451_v36 = vpop.permute.xlu2 %450 }
  0xd2   : > { %v493_v10 = vpop.permute.xlu1 %492  ;;  %v507_v11 = vpop.permute.xlu0 %506 }
  0xd3   : > { %v439_v53 = vpop.permute.xlu2 %438 }
  0xda   : > { %v495_v19 = vpop.permute.xlu1 %494  ;;  %v509_v20 = vpop.permute.xlu0 %508 }
  0xdb   : > { %v497_v23 = vsel %vm496_vm1, %v493_v10, %v495_v19  ;;  %v498_v24 = vsel %vm496_vm1, %v495_v19, %v493_v10  ;;  %v511_v25 = vsel %vm510_vm2, %v507_v11, %v509_v20  ;;  %v512_v26 = vsel %vm510_vm2, %v509_v20, %v507_v11  ;;  %v373_v11 = vld [vmem:[#allocation9] ss:$8 sm:$0x3]  ;;  %v407_v13 = vpop.permute.xlu2 %406 }
  0xdc   : > { %v518_v27 = vmul.f32 %v514_v16, %v511_v25  ;;  %v519_v28 = vmul.f32 %v515_v17, %v512_v26  ;;  %v504_v34 = vmul.f32 %v500_v21, %v497_v23  ;;  %v505_v35 = vmul.f32 %v501_v22, %v498_v24  ;;  %v368_v21 = vld [vmem:[%s1318_s2] sm:$0x3] }
  0xdd   : > { %v416_v14 = vperm.slane %v373_v11, 0  ;;  %v417_v15 = vperm.slane %v373_v11, 1  ;;  %v574_v26 = vstv %s753_s23 }
  0xde   : > { %536 = vmatpush.msra.mxu0 %v518_v27  ;;  %556 = vmatpush.msra.mxu1 %v519_v28 }
  0xe0   : > { %537 = vmatpush.msra.mxu0 %v504_v34  ;;  %557 = vmatpush.msra.mxu1 %v505_v35 }
  0xe2   : > { %v467_v43 = vpop.permute.xlu1 %466  ;;  %v465_v44 = vpop.permute.xlu0 %464  ;;  %538 = vmatpush.msra.mxu0 %v490_v37  ;;  %558 = vmatpush.msra.mxu1 %v491_v38 }
  0xe3   : > { %v469_v45 = vsel %vm468_vm4, %v465_v44, %v467_v43  ;;  %v470_v46 = vsel %vm468_vm4, %v467_v43, %v465_v44  ;;  %v594_v43 = vld.sshfl [vmem:[#allocation1 + $0x8] sm:$0xff pattern:$0x75316420] }
  0xe4   : > { %v476_v47 = vmul.f32 %v472_v39, %v469_v45  ;;  %v477_v48 = vmul.f32 %v473_v40, %v470_v46  ;;  %v593_v46 = vld.sshfl [vmem:[#allocation1] sm:$0xff pattern:$0x75316420] }
  0xe6   : > { %539 = vmatpush.msra.mxu0 %v476_v47  ;;  %559 = vmatpush.msra.mxu1 %v477_v48 }
  0xe8   : > { %540 = vmatpush.msra.mxu0 %v1238_v6  ;;  %560 = vmatpush.msra.mxu1 %v1244_v7 }
  0xea   : > { %v437_v56 = vpop.permute.xlu1 %436  ;;  %v453_v57 = vpop.permute.xlu0 %452 }
  0xeb   : > { %v455_v58 = vsel %vm454_vm5, %v451_v36, %v453_v57  ;;  %v456_v59 = vsel %vm454_vm5, %v453_v57, %v451_v36  ;;  %v441_v60 = vsel %vm440_vm6, %v437_v56, %v439_v53  ;;  %v442_v61 = vsel %vm440_vm6, %v439_v53, %v437_v56 }
  0xec   : > { %v462_v62 = vmul.f32 %v458_v51, %v456_v59  ;;  %v463_v63 = vmul.f32 %v459_v52, %v455_v58  ;;  %v448_v0 = vmul.f32 %v444_v54, %v442_v61  ;;  %v449_v1 = vmul.f32 %v445_v55, %v441_v60 }
  0xed   : > { %v585_v36 = vstv %s370_s20 }
  0xee   : > { %541 = vmatpush.msra.mxu0 %v462_v62  ;;  %561 = vmatpush.msra.mxu1 %v463_v63 }
  0xf0   : > { %542 = vmatpush.msra.mxu0 %v448_v0  ;;  %562 = vmatpush.msra.mxu1 %v449_v1 }
  0xf2   : > { %v425_v5 = vpop.permute.xlu1 %424  ;;  %v423_v6 = vpop.permute.xlu0 %422 }
  0xf3   : > { %v427_v7 = vsel %vm426_vm7, %v423_v6, %v425_v5  ;;  %v428_v8 = vsel %vm426_vm7, %v425_v5, %v423_v6 }
  0xf4   : > { %v434_v9 = vmul.f32 %v430_v3, %v428_v8  ;;  %v435_v10 = vmul.f32 %v431_v4, %v427_v7 }
  0xf6   : > { %543 = vmatpush.msra.mxu0 %v434_v9  ;;  %563 = vmatpush.msra.mxu1 %v435_v10 }
  0xfa   : > { %v409_v16 = vpop.permute.xlu0 %408  ;;  %v523_v22 = vpop.permute.xlu1 %522 }
  0xfb   : > { %v413_v17 = vsel %vm412_vm8, %v407_v13, %v409_v16  ;;  %v414_v18 = vsel %vm412_vm8, %v409_v16, %v407_v13 }
  0xfc   : > { %v420_v19 = vmul.f32 %v416_v14, %v414_v18  ;;  %v421_v20 = vmul.f32 %v417_v15, %v413_v17 }
  0xfe   : > { %544 = vmatpush.msra.mxu0 %v420_v19  ;;  %564 = vmatpush.msra.mxu1 %v421_v20 }
  0xff   : > { %754 = vmatmul.msk.f32.vlgmr.msra.gmra.mxu0 %vm525_vm9, %v368_v21  ;;  %755 = vmatmul.msk.f32.vlgmr.msra.gmra.mxu1 %vm525_vm9, %v368_v21 }
 0x17c   : > { %v546_v12 = vpop.f32.mrf.mxu0  ;;  %v566_v23 = vpop.f32.mrf.mxu1 }
 0x17d   : > { %v547_v24 = vadd.f32 %v546_v12, %v523_v22  ;;  %v567_v25 = vadd.f32 %v566_v23, %v523_v22 }
 0x17f   : > { %v569_v27 = vmax.f32 %v547_v24, 0.0  ;;  %v570_v28 = vmax.f32 %v567_v25, 0.0 }
 0x181   : > { %v575_v30 = vmul.f32 %v574_v26, %v569_v27  ;;  %v576_v31 = vmul.f32 %v574_v26, %v570_v28  ;;  %v572_v32 = vmul.f32 %v571_v29, %v569_v27  ;;  %v573_v34 = vmul.f32 %v571_v29, %v570_v28 }
 0x183   : > { %v579_v33 = vrot.slane %v575_v30, 1  ;;  %v580_v35 = vrot.slane %v576_v31, 1 }
 0x185   : > { %v583_v37 = vadd.f32 %v579_v33, %v572_v32  ;;  %v584_v38 = vadd.f32 %v580_v35, %v573_v34 }
 0x187   : > { %v586_v39 = vadd.f32 %v585_v36, %v583_v37  ;;  %v587_v40 = vadd.f32 %v585_v36, %v584_v38 }
 0x189   : > { %v588_v41 = vmax.f32 %v586_v39, 0.0  ;;  %v589_v42 = vmax.f32 %v587_v40, 0.0 }
 0x18b   : > { %v590_v44 = vperm.slane %v588_v41, 0  ;;  %v591_v45 = vperm.slane %v589_v42, 0 }
 0x18d   : > { %v598_v47 = vmul.f32 %v594_v43, %v591_v45  ;;  %v597_v48 = vmul.f32 %v593_v46, %v590_v44 }
 0x18f   : > { %v601_v49 = vrot.slane %v598_v47, 4 }
 0x191   : > { %v602_v50 = vsel %vm403_vm0, %v597_v48, %v601_v49 }
 0x192   : > { %604 = vst [vmem:[%s367_s18] sm:$0xff] %v602_v50 }
 0x193   : > { %981 = shalt.err (!%p978_p10)
}
 0x194   : > { %776 = dma.vmem_to_hbm [thread:$0]  (%p1159_p4), %s620_s19, 128, %s622_s22, %s606_s9  }
 0x195 PF: > { %s633_s3 = sand.u32 1, %s1020_s26   ;;  %p1340_p11 = scmp.ge.s32.totalorder %s1032_s29, 2 }
 0x196   : > { %s634_s16 = scalar_lea.sflag [#allocation5], %s633_s3 }
 0x197   : > { %p793_p5 = pnand %p1340_p11, %p1163_p6 }
 0x199   : > { %p794_p13 = pneg %p793_p5 }
 0x19b   : > { %1015 = dma.done.wait (%p794_p13), %s634_s16, 128  }
 0x19c   : > { %1017 = vsyncadd (%p794_p13), %s634_s16, 4294967168  ;;  %s1341_s29 = sld [smem:[#allocation18_spill]]  ;;  %s1344_s26 = smov %s1024_s27 }
 0x19d   : > { %s1342_s21 = sld [smem:[#allocation17_spill]] }
 0x19e   : > { %s1343_s28 = sld [smem:[#allocation19_spill]] }
 0x1a2   : > { %p25_p0 = scmp.ge.s32.totalorder %s1341_s29, 4  }
 0x1a3   : > { %s1345_s27 = smov %s1342_s21 }
 0x1a4   :  { %27 = sbr.rel (!%p25_p0) target bundleno = 12 (0xc), region = 123 }
 0x1a9   :  { %640 = vsyncpa [#allocation4], 1 }
 0x1aa   :  { %642 = vsyncpa [#allocation4 + $0x1], 1 }
 0x1ab   :  { %643 = vsyncpa [#allocation8], 1 }
 0x1ac   :  { %645 = vsyncpa [#allocation8 + $0x1], 1 }
 0x1ad   :  { %646 = vsyncpa [#allocation5], 1 }
 0x1ae   :  { %648 = vsyncpa [#allocation5 + $0x1], 1 }
 0x1af   :  { %649 = vsyncpa [#allocation6], 1 }
 0x1b0   :  { %651 = vsyncpa [#allocation6 + $0x1], 1 }

</bundles_post_ra>
